<compile_context>
chip_gen: v7x
topology: tpu7x:2x2x1
jax: 0.10.0
libtpu: 0.0.40
codegen_flags: <defaults>
</compile_context>

<pallas_src>
import functools

import jax
import jax.numpy as jnp
from jax.experimental import pallas as pl
from jax.experimental.pallas import tpu as pltpu


def _row_tile(n, target):
    """Pick a row tile that divides n, is a multiple of 8 (sublane) or the full
    extent, prefers >= 2 grid steps (both v7x TensorCores), and is <= target."""
    cands = [t for t in range(8, min(target, n) + 1, 8) if n % t == 0]
    if not cands:
        return n
    multi = [t for t in cands if n // t >= 2]
    return max(multi) if multi else max(cands)


# ----------------------------------------------------------------------------
# Kernel 1: text encoder — fused gather + masked mean pool + (pre-folded) linear
#   pooled[n,h] = sum_s mask_norm[n,s] * table[ids[n,s], h]
#   out         = pooled @ W + b  ==  weights @ (table @ W) + b
#   weights (TN, V) is accumulated per token step (no (TN, S, V) intermediate).
# ----------------------------------------------------------------------------
def _text_encoder_kernel(ids_ref, mask_ref, w_eff_ref, b_ref, o_ref):
    ids = ids_ref[...]                                             # (TN, S) i32
    mask = mask_ref[...]                                           # (TN, S) f32
    denom = jnp.maximum(jnp.sum(mask, axis=1, keepdims=True), 1.0)
    mask_norm = mask / denom                                       # (TN, S)

    tn = ids.shape[0]
    s = ids.shape[1]
    v = w_eff_ref.shape[0]
    vocab_iota = jax.lax.broadcasted_iota(jnp.int32, (1, v), 1)    # hoisted

    weights = jnp.zeros((tn, v), jnp.float32)                      # (TN, V)
    for t in range(s):                                             # unrolled, VPU
        weights = weights + jnp.where(ids[:, t:t + 1] == vocab_iota,
                                      mask_norm[:, t:t + 1], 0.0)

    o_ref[...] = (jnp.dot(weights, w_eff_ref[...],
                          preferred_element_type=jnp.float32)
                  + b_ref[...])                                    # (TN, D)


def text_encode(ids, mask, w_eff, b, *, row_tile_target=512):
    n, s = ids.shape
    v, d = w_eff.shape
    tn = _row_tile(n, row_tile_target)
    return pl.pallas_call(
        _text_encoder_kernel,
        out_shape=jax.ShapeDtypeStruct((n, d), jnp.float32),
        grid=(n // tn,),
        in_specs=[
            pl.BlockSpec((tn, s), lambda i: (i, 0)),
            pl.BlockSpec((tn, s), lambda i: (i, 0)),
            pl.BlockSpec((v, d), lambda i: (0, 0)),
            pl.BlockSpec((1, d), lambda i: (0, 0)),
        ],
        out_specs=pl.BlockSpec((tn, d), lambda i: (i, 0)),
        compiler_params=pltpu.CompilerParams(
            dimension_semantics=("parallel",)),
    )(ids, mask.astype(jnp.float32), w_eff, b)


# ----------------------------------------------------------------------------
# Kernel 2: fused gc-encoder MLP + L2 normalize + MoCo similarity scoring
# ----------------------------------------------------------------------------
def _gc_score_kernel(q_ref, d_ref, lon_ref, lat_ref, w1_ref, b1_ref,
                     w2_ref, b2_ref, ds_ref, gs_ref, *, inv_t):
    eps2 = 1e-24                     # (F.normalize eps = 1e-12) squared
    q = q_ref[...]                   # (TB, D)
    d = d_ref[...]                   # (TB, C, D)
    lon = lon_ref[...]               # (TB, C)
    lat = lat_ref[...]               # (TB, C)

    # gc_encoder_shadow: Linear(2,H) as two VPU broadcast-FMAs + ReLU, then one
    # flattened (TB*C, H) @ (H, D) MXU matmul (w2 stays stationary).
    h = (lon[:, :, None] * w1_ref[0:1, :][None]
         + lat[:, :, None] * w1_ref[1:2, :][None]
         + b1_ref[...][None])                                      # (TB, C, H)
    h = jnp.maximum(h, 0.0)
    tb, c, hdim = h.shape
    g = (jnp.dot(h.reshape(tb * c, hdim), w2_ref[...],
                 preferred_element_type=jnp.float32).reshape(tb, c, -1)
         + b2_ref[...][None])                                      # (TB, C, D)

    # F.normalize (default dim=1):
    #   query (B, D)    -> feature axis; 1/T folded in once here
    #   docs  (B*C, D)  -> feature axis
    #   gls   (B, C, D) -> axis=1 (candidate axis), faithful to the reference
    qn = q * jax.lax.rsqrt(
        jnp.maximum(jnp.sum(q * q, axis=-1, keepdims=True), eps2)) * inv_t
    dn = d * jax.lax.rsqrt(
        jnp.maximum(jnp.sum(d * d, axis=-1, keepdims=True), eps2))
    gn = g * jax.lax.rsqrt(
        jnp.maximum(jnp.sum(g * g, axis=1, keepdims=True), eps2))

    # einsum('bik,bjk->bij') with i=1  ==  per-candidate dot: VPU mul + lane
    # reduce (XLU), avoiding M=1 MXU pushes.
    q3 = qn[:, None, :]                                            # (TB, 1, D)
    ds_ref[...] = jnp.sum(dn * q3, axis=-1)                        # (TB, C)
    gs_ref[...] = jnp.sum(gn * q3, axis=-1)                        # (TB, C)


def gc_score(q_emb, d_emb3, gls_lon, gls_lat, w1, b1, w2, b2, temperature,
             *, batch_tile_target=128):
    b, d = q_emb.shape
    _, c, _ = d_emb3.shape
    h = w1.shape[1]
    tb = _row_tile(b, batch_tile_target)
    kernel = functools.partial(_gc_score_kernel, inv_t=float(1.0 / temperature))
    return pl.pallas_call(
        kernel,
        out_shape=(jax.ShapeDtypeStruct((b, c), jnp.float32),
                   jax.ShapeDtypeStruct((b, c), jnp.float32)),
        grid=(b // tb,),
        in_specs=[
            pl.BlockSpec((tb, d), lambda i: (i, 0)),
            pl.BlockSpec((tb, c, d), lambda i: (i, 0, 0)),
            pl.BlockSpec((tb, c), lambda i: (i, 0)),
            pl.BlockSpec((tb, c), lambda i: (i, 0)),
            pl.BlockSpec((2, h), lambda i: (0, 0)),
            pl.BlockSpec((1, h), lambda i: (0, 0)),
            pl.BlockSpec((h, d), lambda i: (0, 0)),
            pl.BlockSpec((1, d), lambda i: (0, 0)),
        ],
        out_specs=(pl.BlockSpec((tb, c), lambda i: (i, 0)),
                   pl.BlockSpec((tb, c), lambda i: (i, 0))),
        compiler_params=pltpu.CompilerParams(
            dimension_semantics=("parallel",)),
    )(q_emb, d_emb3, gls_lon, gls_lat, w1, b1, w2, b2)


# ----------------------------------------------------------------------------
# Full forward pass (reshape/slice glue in plain JAX; compute in Pallas kernels)
# ----------------------------------------------------------------------------
def multimodal_moco_forward(params, query_ids, query_mask, docs_ids, docs_mask,
                            gls, temperature):
    bs = query_ids.shape[0]
    n_docs = docs_ids.shape[0]
    assert n_docs % bs == 0
    doc_nums = n_docs // bs

    # Pre-fold the text projection once (tiny, plain JAX):
    #   pooled @ W + b == weights @ (table @ W) + b
    wq_eff = params["emb_q"] @ params["wq"]                        # (V, D)
    wk_eff = params["emb_k"] @ params["wk"]                        # (V, D)

    q_emb = text_encode(query_ids, query_mask, wq_eff, params["bq"])   # (bs, D)
    d_emb = text_encode(docs_ids, docs_mask, wk_eff, params["bk"])     # (bs*C, D)

    d = q_emb.shape[1]
    d3 = d_emb.reshape(bs, doc_nums, d)         # copy-free reshape, no padding
    glsf = gls.astype(jnp.float32)
    gls_lon = glsf[:, :, 0]                     # (bs, C) lane-dense
    gls_lat = glsf[:, :, 1]                     # (bs, C) lane-dense

    docs_score, gls_score = gc_score(
        q_emb, d3, gls_lon, gls_lat,
        params["gc_w1"], params["gc_b1"], params["gc_w2"], params["gc_b2"],
        temperature)
    labels = jnp.zeros((bs,), dtype=jnp.int32)
    return docs_score, gls_score, labels


# ----------------------------------------------------------------------------
# Pure-JAX reference of the same forward (numerical sanity check)
# ----------------------------------------------------------------------------
def _reference_forward(params, query_ids, query_mask, docs_ids, docs_mask,
                       gls, temperature):
    def enc_text(ids, mask, table, w, b):
        emb = jnp.take(table, ids, axis=0)                         # (N, S, H)
        denom = jnp.maximum(jnp.sum(mask, axis=1, keepdims=True), 1.0)
        pooled = jnp.sum(emb * mask[:, :, None], axis=1) / denom
        return pooled @ w + b

    def l2n(x, axis):
        n = jnp.sqrt(jnp.sum(x * x, axis=axis, keepdims=True))
        return x / jnp.maximum(n, 1e-12)

    bs = query_ids.shape[0]
    doc_nums = docs_ids.shape[0] // bs
    q = enc_text(query_ids, query_mask, params["emb_q"], params["wq"], params["bq"])
    dd = enc_text(docs_ids, docs_mask, params["emb_k"], params["wk"], params["bk"])
    g = gls.astype(jnp.float32)
    hid = jnp.maximum(g @ params["gc_w1"] + params["gc_b1"], 0.0)
    g = hid @ params["gc_w2"] + params["gc_b2"]                    # (bs, C, D)
    qn = l2n(q, -1)
    dn = l2n(dd, -1).reshape(bs, doc_nums, -1)
    gn = l2n(g, 1)                                                 # dim=1 on 3-D
    ds = jnp.einsum('bd,bcd->bc', qn, dn) / temperature
    gs = jnp.einsum('bd,bcd->bc', qn, gn) / temperature
    return ds, gs


if __name__ == "__main__":
    # small shapes consistent with the module's forward
    bs, doc_nums, S, vocab, H, D = 2, 4, 8, 32, 32, 128
    T = 0.07

    key = jax.random.PRNGKey(0)
    keys = jax.random.split(key, 12)

    params = {
        "emb_q": 0.02 * jax.random.normal(keys[0], (vocab, H), jnp.float32),
        "wq":    0.05 * jax.random.normal(keys[1], (H, D), jnp.float32),
        "bq":    0.01 * jax.random.normal(keys[2], (1, D), jnp.float32),
        "emb_k": 0.02 * jax.random.normal(keys[3], (vocab, H), jnp.float32),
        "wk":    0.05 * jax.random.normal(keys[4], (H, D), jnp.float32),
        "bk":    0.01 * jax.random.normal(keys[5], (1, D), jnp.float32),
        "gc_w1": 0.5 * jax.random.normal(keys[6], (2, H), jnp.float32),
        "gc_b1": 0.1 * jax.random.normal(keys[7], (1, H), jnp.float32),
        "gc_w2": 0.1 * jax.random.normal(keys[8], (H, D), jnp.float32),
        "gc_b2": 0.01 * jax.random.normal(keys[9], (1, D), jnp.float32),
    }

    # pre-tokenized inputs (TODO(synk): host-side string tokenizer omitted)
    query_ids = jax.random.randint(keys[10], (bs, S), 0, vocab, jnp.int32)
    docs_ids = jax.random.randint(keys[11], (bs * doc_nums, S), 0, vocab, jnp.int32)
    query_mask = (jax.random.uniform(keys[10], (bs, S)) > 0.2).astype(jnp.float32)
    query_mask = query_mask.at[:, 0].set(1.0)
    docs_mask = (jax.random.uniform(keys[11], (bs * doc_nums, S)) > 0.2).astype(jnp.float32)
    docs_mask = docs_mask.at[:, 0].set(1.0)
    gls = jax.random.normal(keys[9], (bs, doc_nums, 2), jnp.float32)

    docs_score, gls_score, labels = multimodal_moco_forward(
        params, query_ids, query_mask, docs_ids, docs_mask, gls, T)
    jax.block_until_ready((docs_score, gls_score, labels))

    assert docs_score.shape == (bs, doc_nums)
    assert gls_score.shape == (bs, doc_nums)
    assert labels.shape == (bs,)

    ds_expect, gs_expect = _reference_forward(
        params, query_ids, query_mask, docs_ids, docs_mask, gls, T)
    assert bool(jnp.allclose(docs_score, ds_expect, rtol=2e-4, atol=2e-4))
    assert bool(jnp.allclose(gls_score, gs_expect, rtol=2e-4, atol=2e-4))

    print("KERNEL_OK")
</pallas_src>

<mosaic_0001>
module attributes {stable_mosaic.version = 11 : i64} {
  func.func @_text_encoder_kernel(%arg0: i32, %arg1: memref<2x8xi32, #tpu.memory_space<vmem>>, %arg2: memref<2x8xf32, #tpu.memory_space<vmem>>, %arg3: memref<32x128xf32, #tpu.memory_space<vmem>>, %arg4: memref<1x128xf32, #tpu.memory_space<vmem>>, %arg5: memref<2x128xf32, #tpu.memory_space<vmem>>) attributes {dimension_semantics = [#tpu.dimension_semantics<parallel>], iteration_bounds = array<i64: 1>, scalar_prefetch = 0 : i64, scratch_operands = 0 : i64, tpu.core_type = #tpu.core_type<tc>, window_params = [{transform_indices = @transform_0, window_bounds = array<i64: 2, 8>}, {transform_indices = @transform_1, window_bounds = array<i64: 2, 8>}, {pipeline_mode = #tpu.pipeline_mode<synchronous>, transform_indices = @transform_2, window_bounds = array<i64: 32, 128>}, {pipeline_mode = #tpu.pipeline_mode<synchronous>, transform_indices = @transform_3, window_bounds = array<i64: 1, 128>}, {transform_indices = @transform_4, window_bounds = array<i64: 2, 128>}]} {
    %c0 = arith.constant 0 : index
    %c0_0 = arith.constant 0 : index
    %0 = vector.load %arg1[%c0, %c0_0] : memref<2x8xi32, #tpu.memory_space<vmem>>, vector<2x8xi32>
    %c0_1 = arith.constant 0 : index
    %c0_2 = arith.constant 0 : index
    %1 = vector.load %arg2[%c0_1, %c0_2] : memref<2x8xf32, #tpu.memory_space<vmem>>, vector<2x8xf32>
    %cst = arith.constant dense<0.000000e+00> : vector<2xf32>
    %2 = vector.multi_reduction <add>, %1, %cst [1] : vector<2x8xf32> to vector<2xf32>
    %3 = vector.shape_cast %2 : vector<2xf32> to vector<2x1xf32>
    %cst_3 = arith.constant 1.000000e+00 : f32
    %4 = vector.broadcast %cst_3 : f32 to vector<2x1xf32>
    %5 = arith.maximumf %3, %4 : vector<2x1xf32>
    %6 = vector.broadcast %5 : vector<2x1xf32> to vector<2x8xf32>
    %7 = arith.divf %1, %6 : vector<2x8xf32>
    %8 = tpu.iota {dimensions = array<i32: 1>} : vector<1x32xi32>
    %cst_4 = arith.constant 0.000000e+00 : f32
    %9 = vector.broadcast %cst_4 : f32 to vector<2x32xf32>
    %10 = vector.extract_strided_slice %0 {offsets = [0, 0], sizes = [2, 1], strides = [1, 1]} : vector<2x8xi32> to vector<2x1xi32>
    %11 = vector.broadcast %10 : vector<2x1xi32> to vector<2x32xi32>
    %12 = vector.broadcast %8 : vector<1x32xi32> to vector<2x32xi32>
    %13 = arith.cmpi eq, %11, %12 : vector<2x32xi32>
    %14 = vector.extract_strided_slice %7 {offsets = [0, 0], sizes = [2, 1], strides = [1, 1]} : vector<2x8xf32> to vector<2x1xf32>
    %cst_5 = arith.constant 0.000000e+00 : f32
    %15 = vector.shape_cast %14 : vector<2x1xf32> to vector<2x1xf32>
    %16 = vector.broadcast %15 : vector<2x1xf32> to vector<2x32xf32>
    %17 = vector.broadcast %cst_5 : f32 to vector<2x32xf32>
    %18 = arith.select %13, %16, %17 : vector<2x32xi1>, vector<2x32xf32>
    %19 = arith.addf %9, %18 : vector<2x32xf32>
    %20 = vector.extract_strided_slice %0 {offsets = [0, 1], sizes = [2, 1], strides = [1, 1]} : vector<2x8xi32> to vector<2x1xi32>
    %21 = vector.broadcast %20 : vector<2x1xi32> to vector<2x32xi32>
    %22 = vector.broadcast %8 : vector<1x32xi32> to vector<2x32xi32>
    %23 = arith.cmpi eq, %21, %22 : vector<2x32xi32>
    %24 = vector.extract_strided_slice %7 {offsets = [0, 1], sizes = [2, 1], strides = [1, 1]} : vector<2x8xf32> to vector<2x1xf32>
    %cst_6 = arith.constant 0.000000e+00 : f32
    %25 = vector.shape_cast %24 : vector<2x1xf32> to vector<2x1xf32>
    %26 = vector.broadcast %25 : vector<2x1xf32> to vector<2x32xf32>
    %27 = vector.broadcast %cst_6 : f32 to vector<2x32xf32>
    %28 = arith.select %23, %26, %27 : vector<2x32xi1>, vector<2x32xf32>
    %29 = arith.addf %19, %28 : vector<2x32xf32>
    %30 = vector.extract_strided_slice %0 {offsets = [0, 2], sizes = [2, 1], strides = [1, 1]} : vector<2x8xi32> to vector<2x1xi32>
    %31 = vector.broadcast %30 : vector<2x1xi32> to vector<2x32xi32>
    %32 = vector.broadcast %8 : vector<1x32xi32> to vector<2x32xi32>
    %33 = arith.cmpi eq, %31, %32 : vector<2x32xi32>
    %34 = vector.extract_strided_slice %7 {offsets = [0, 2], sizes = [2, 1], strides = [1, 1]} : vector<2x8xf32> to vector<2x1xf32>
    %cst_7 = arith.constant 0.000000e+00 : f32
    %35 = vector.shape_cast %34 : vector<2x1xf32> to vector<2x1xf32>
    %36 = vector.broadcast %35 : vector<2x1xf32> to vector<2x32xf32>
    %37 = vector.broadcast %cst_7 : f32 to vector<2x32xf32>
    %38 = arith.select %33, %36, %37 : vector<2x32xi1>, vector<2x32xf32>
    %39 = arith.addf %29, %38 : vector<2x32xf32>
    %40 = vector.extract_strided_slice %0 {offsets = [0, 3], sizes = [2, 1], strides = [1, 1]} : vector<2x8xi32> to vector<2x1xi32>
    %41 = vector.broadcast %40 : vector<2x1xi32> to vector<2x32xi32>
    %42 = vector.broadcast %8 : vector<1x32xi32> to vector<2x32xi32>
    %43 = arith.cmpi eq, %41, %42 : vector<2x32xi32>
    %44 = vector.extract_strided_slice %7 {offsets = [0, 3], sizes = [2, 1], strides = [1, 1]} : vector<2x8xf32> to vector<2x1xf32>
    %cst_8 = arith.constant 0.000000e+00 : f32
    %45 = vector.shape_cast %44 : vector<2x1xf32> to vector<2x1xf32>
    %46 = vector.broadcast %45 : vector<2x1xf32> to vector<2x32xf32>
    %47 = vector.broadcast %cst_8 : f32 to vector<2x32xf32>
    %48 = arith.select %43, %46, %47 : vector<2x32xi1>, vector<2x32xf32>
    %49 = arith.addf %39, %48 : vector<2x32xf32>
    %50 = vector.extract_strided_slice %0 {offsets = [0, 4], sizes = [2, 1], strides = [1, 1]} : vector<2x8xi32> to vector<2x1xi32>
    %51 = vector.broadcast %50 : vector<2x1xi32> to vector<2x32xi32>
    %52 = vector.broadcast %8 : vector<1x32xi32> to vector<2x32xi32>
    %53 = arith.cmpi eq, %51, %52 : vector<2x32xi32>
    %54 = vector.extract_strided_slice %7 {offsets = [0, 4], sizes = [2, 1], strides = [1, 1]} : vector<2x8xf32> to vector<2x1xf32>
    %cst_9 = arith.constant 0.000000e+00 : f32
    %55 = vector.shape_cast %54 : vector<2x1xf32> to vector<2x1xf32>
    %56 = vector.broadcast %55 : vector<2x1xf32> to vector<2x32xf32>
    %57 = vector.broadcast %cst_9 : f32 to vector<2x32xf32>
    %58 = arith.select %53, %56, %57 : vector<2x32xi1>, vector<2x32xf32>
    %59 = arith.addf %49, %58 : vector<2x32xf32>
    %60 = vector.extract_strided_slice %0 {offsets = [0, 5], sizes = [2, 1], strides = [1, 1]} : vector<2x8xi32> to vector<2x1xi32>
    %61 = vector.broadcast %60 : vector<2x1xi32> to vector<2x32xi32>
    %62 = vector.broadcast %8 : vector<1x32xi32> to vector<2x32xi32>
    %63 = arith.cmpi eq, %61, %62 : vector<2x32xi32>
    %64 = vector.extract_strided_slice %7 {offsets = [0, 5], sizes = [2, 1], strides = [1, 1]} : vector<2x8xf32> to vector<2x1xf32>
    %cst_10 = arith.constant 0.000000e+00 : f32
    %65 = vector.shape_cast %64 : vector<2x1xf32> to vector<2x1xf32>
    %66 = vector.broadcast %65 : vector<2x1xf32> to vector<2x32xf32>
    %67 = vector.broadcast %cst_10 : f32 to vector<2x32xf32>
    %68 = arith.select %63, %66, %67 : vector<2x32xi1>, vector<2x32xf32>
    %69 = arith.addf %59, %68 : vector<2x32xf32>
    %70 = vector.extract_strided_slice %0 {offsets = [0, 6], sizes = [2, 1], strides = [1, 1]} : vector<2x8xi32> to vector<2x1xi32>
    %71 = vector.broadcast %70 : vector<2x1xi32> to vector<2x32xi32>
    %72 = vector.broadcast %8 : vector<1x32xi32> to vector<2x32xi32>
    %73 = arith.cmpi eq, %71, %72 : vector<2x32xi32>
    %74 = vector.extract_strided_slice %7 {offsets = [0, 6], sizes = [2, 1], strides = [1, 1]} : vector<2x8xf32> to vector<2x1xf32>
    %cst_11 = arith.constant 0.000000e+00 : f32
    %75 = vector.shape_cast %74 : vector<2x1xf32> to vector<2x1xf32>
    %76 = vector.broadcast %75 : vector<2x1xf32> to vector<2x32xf32>
    %77 = vector.broadcast %cst_11 : f32 to vector<2x32xf32>
    %78 = arith.select %73, %76, %77 : vector<2x32xi1>, vector<2x32xf32>
    %79 = arith.addf %69, %78 : vector<2x32xf32>
    %80 = vector.extract_strided_slice %0 {offsets = [0, 7], sizes = [2, 1], strides = [1, 1]} : vector<2x8xi32> to vector<2x1xi32>
    %81 = vector.broadcast %80 : vector<2x1xi32> to vector<2x32xi32>
    %82 = vector.broadcast %8 : vector<1x32xi32> to vector<2x32xi32>
    %83 = arith.cmpi eq, %81, %82 : vector<2x32xi32>
    %84 = vector.extract_strided_slice %7 {offsets = [0, 7], sizes = [2, 1], strides = [1, 1]} : vector<2x8xf32> to vector<2x1xf32>
    %cst_12 = arith.constant 0.000000e+00 : f32
    %85 = vector.shape_cast %84 : vector<2x1xf32> to vector<2x1xf32>
    %86 = vector.broadcast %85 : vector<2x1xf32> to vector<2x32xf32>
    %87 = vector.broadcast %cst_12 : f32 to vector<2x32xf32>
    %88 = arith.select %83, %86, %87 : vector<2x32xi1>, vector<2x32xf32>
    %89 = arith.addf %79, %88 : vector<2x32xf32>
    %c0_13 = arith.constant 0 : index
    %c0_14 = arith.constant 0 : index
    %90 = vector.load %arg3[%c0_13, %c0_14] : memref<32x128xf32, #tpu.memory_space<vmem>>, vector<32x128xf32>
    %cst_15 = arith.constant dense<0.000000e+00> : vector<2x128xf32>
    %91 = tpu.matmul %89, %90, %cst_15 {dimension_numbers = #tpu.dot_dimension_numbers<[1], [0], [0], [1], [0, 0, 1, 1], [], []>} : vector<2x32xf32>, vector<32x128xf32>, vector<2x128xf32> -> vector<2x128xf32>
    %c0_16 = arith.constant 0 : index
    %c0_17 = arith.constant 0 : index
    %92 = vector.load %arg4[%c0_16, %c0_17] : memref<1x128xf32, #tpu.memory_space<vmem>>, vector<1x128xf32>
    %93 = vector.broadcast %92 : vector<1x128xf32> to vector<2x128xf32>
    %94 = arith.addf %91, %93 : vector<2x128xf32>
    %c0_18 = arith.constant 0 : index
    %c0_19 = arith.constant 0 : index
    %95 = vector.load %arg5[%c0_18, %c0_19] : memref<2x128xf32, #tpu.memory_space<vmem>>, vector<2x128xf32>
    tpu.vector_store %arg5[%c0_18, %c0_19], %94 {strides = array<i32>} : memref<2x128xf32, #tpu.memory_space<vmem>>, vector<2x128xf32>,
    return
  }
  func.func @transform_0(%arg0: i32) -> (i32, i32) {
    %c0_i32 = arith.constant 0 : i32
    %c0_i32_0 = arith.constant 0 : i32
    return %arg0, %c0_i32 : i32, i32
  }
  func.func @transform_1(%arg0: i32) -> (i32, i32) {
    %c0_i32 = arith.constant 0 : i32
    %c0_i32_0 = arith.constant 0 : i32
    return %arg0, %c0_i32 : i32, i32
  }
  func.func @transform_2(%arg0: i32) -> (i32, i32) {
    %c0_i32 = arith.constant 0 : i32
    %c0_i32_0 = arith.constant 0 : i32
    %c0_i32_1 = arith.constant 0 : i32
    return %c0_i32, %c0_i32_0 : i32, i32
  }
  func.func @transform_3(%arg0: i32) -> (i32, i32) {
    %c0_i32 = arith.constant 0 : i32
    %c0_i32_0 = arith.constant 0 : i32
    %c0_i32_1 = arith.constant 0 : i32
    return %c0_i32, %c0_i32_0 : i32, i32
  }
  func.func @transform_4(%arg0: i32) -> (i32, i32) {
    %c0_i32 = arith.constant 0 : i32
    %c0_i32_0 = arith.constant 0 : i32
    return %arg0, %c0_i32 : i32, i32
  }
}

</mosaic_0001>

<bundles_post_ra>
// kernel: tpu_custom_call.1
= control target key start
LH: loop header
LB: loop body
LE: loop exit
PB: predicated region body
PF: predicated region fallthrough
CT: control target
= control target key end

     0   :  { %9 = vsyncpa [#allocation3], 0  ;;  %s458_s0 = inlined_call_operand.hbm [shape: s32[2,8], index: 0, kind: input, shape index: {}]   ;;  %s459_s1 = inlined_call_operand.vmem [shape: f32[2,8], index: 1, kind: input, shape index: {}]   ;;  %s460_s2 = inlined_call_operand.hbm [shape: f32[32,128], index: 2, kind: input, shape index: {}]   ;;  %s461_s3 = inlined_call_operand.vmem [shape: f32[1,128], index: 3, kind: input, shape index: {}]   ;;  %s462_s4 = inlined_call_operand.hbm [shape: f32[2,128], index: 4, kind: output, shape index: {}]  }
   0x1   :  { %10 = vsyncpa [#allocation6], 0 }
   0x2   :  { %11 = vsyncpa [#allocation4], 0  ;;  %s368_s15 = smov [#allocation2]   ;;  %s369_s17 = smov [#allocation5]  }
   0x3   :  { %s18_s16 = sshll.u32 %s368_s15, 4  ;;  %s29_s18 = sshll.u32 %s369_s17, 4  ;;  %s19_s16 = int_to_ptr.vmem [resolvable:$true] %s18_s16  ;;  %s409_s18 = int_to_ptr.vmem [resolvable:$true] %s29_s18 }
   0x4   :  { %s296_s21 = scalar_lea.hbm %s458_s0, 32 }
   0x5   :  { %p297_p0 = scmp.ne.s32.totalorder %s458_s0, %s296_s21  ;;  %p300_p1 = scmp.lt.u32.totalorder %s296_s21, %s458_s0 }
   0x7   :  { %p302_p2 = pnand %p300_p1, %p297_p0 }
   0x9   :  { %305 = shalt.err (!%p302_p2)
}
   0xa   :  { %s306_s26 = scalar_lea.vmem %s19_s16, 32  ;;  %p311_p4 = scmp.lt.s32.totalorder %s19_s16, %s19_s16 }
   0xb   :  { %p307_p3 = scmp.ne.s32.totalorder %s19_s16, %s306_s26  ;;  %p312_p5 = scmp.lt.s32.totalorder %s306_s26, %s306_s26 }
   0xd   :  { %p313_p6 = por %p312_p5, %p311_p4 }
   0xf   :  { %p314_p7 = pnand %p313_p6, %p307_p3 }
  0x11   :  { %317 = shalt.err (!%p314_p7)
}
  0x12   :  { %21 = dma.hbm_to_vmem [thread:$0]  %s458_s0, 32, %s19_s16, [#allocation3]  }
  0x13   :  { %s318_s5 = scalar_lea.hbm %s460_s2, 512 }
  0x14   :  { %p319_p8 = scmp.ne.s32.totalorder %s460_s2, %s318_s5  ;;  %p322_p9 = scmp.lt.u32.totalorder %s318_s5, %s460_s2 }
  0x16   :  { %p324_p10 = pnand %p322_p9, %p319_p8 }
  0x18   :  { %327 = shalt.err (!%p324_p10)
}
  0x19   :  { %s328_s10 = scalar_lea.vmem %s409_s18, 512  ;;  %p333_p12 = scmp.lt.s32.totalorder %s409_s18, %s409_s18 }
  0x1a   :  { %p329_p11 = scmp.ne.s32.totalorder %s409_s18, %s328_s10  ;;  %p334_p13 = scmp.lt.s32.totalorder %s328_s10, %s328_s10 }
  0x1c   :  { %p335_p0 = por %p334_p13, %p333_p12 }
  0x1e   :  { %p336_p1 = pnand %p335_p0, %p329_p11 }
  0x20   :  { %339 = shalt.err (!%p336_p1)
}
  0x21   :  { %s370_s0 = smov 128   ;;  %s371_s11 = smov 8  }
  0x22   :  { %35 = dma.hbm_to_vmem [thread:$0]  %s460_s2, 512, %s409_s18, [#allocation6], %s370_s0, %s370_s0, %s371_s11  }
  0x23   :  { %362 = dma.done.wait [#allocation3], 32  }
  0x24   :  { %363 = vsyncadd [#allocation3], 4294967264 }
  0x25   :  { %364 = dma.done.wait [#allocation6], 512  }
  0x26   :  { %365 = vsyncadd [#allocation6], 4294966784  ;;  %v372_v0 = vmov 1   ;;  %vm46_vm0 = vcmask 58368   ;;  %v45_v1 = vld [vmem:[%s459_s1] sm:$0x3]  ;;  %v53_v31 = vlaneseq }
  0x27   :  { %279 = vset.pattern.permute.xlu1 %v372_v0  ;;  %v44_v2 = vld [vmem:[#allocation2] sm:$0x3]  ;;  %v47_v3 = vsel %vm46_vm0, %v45_v1, 0.0  ;;  %v373_v4 = vmov 2   ;;  %v374_v5 = vmov 3   ;;  %v375_v6 = vmov 4  }
  0x28   :  { %67 = vperm.xlu1 %279, %v44_v2   ;;  %48 = vadd.xlane.f32.xlu0 %v47_v3  ;;  %v376_v7 = vmov 5   ;;  %v377_v8 = vmov 0   ;;  %v378_v9 = vmov 6   ;;  %v379_v14 = vmov 7   ;;  %v136_v16 = vld [vmem:[#allocation5] sm:$0xff]  ;;  %v137_v17 = vld [vmem:[#allocation5 + $0x8] sm:$0xff] }
  0x29   :  { %278 = vset.pattern.permute.xlu0 %v377_v8  ;;  %v380_v15 = vmov 0.0|0.0   ;;  %v257_v18 = vpack.c.bf16 %v137_v17, %v136_v16  ;;  %v138_v19 = vld [vmem:[#allocation5 + $0x10] sm:$0xff]  ;;  %v139_v20 = vld [vmem:[#allocation5 + $0x18] sm:$0xff]  ;;  %vm381_vm1 = vmmov 0   ;;  %v382_v22 = vmov 0.0   ;;  %s383_s16 = smov [#allocation7]  }
  0x2a   :  { %256 = vmatprep.subr.bf16.mxu0 %v380_v15  ;;  %v260_v21 = vpack.c.bf16 %v139_v20, %v138_v19  ;;  %253 = vmatprep.mubr.msk.f32.mxu0 %vm381_vm1, %v382_v22  ;;  %v54_v33 = vand.u32 127, %v53_v31  ;;  %vm147_vm10 = vcmask 261120   ;;  %v238_v56 = vld [vmem:[%s461_s3] ss:$0 sm:$0xff]  ;;  %s228_s17 = sshll.u32 %s383_s16, 4  ;;  %s229_s17 = int_to_ptr.vmem [resolvable:$true] %s228_s17 }
  0x2b   :  { %258 = vmatpush3.bf16.msra.mxu0 %v257_v18  ;;  %s340_s18 = scalar_lea.vmem %s229_s17, 32  ;;  %p345_p3 = scmp.lt.s32.totalorder %s229_s17, %s229_s17 }
  0x2c   :  { %280 = vset.pattern.permute.xlu1 %v373_v4  ;;  %259 = vmatprep.subr.bf16.mxu0 %v380_v15  ;;  %p341_p2 = scmp.ne.s32.totalorder %s229_s17, %s340_s18  ;;  %p346_p4 = scmp.lt.s32.totalorder %s340_s18, %s340_s18 }
  0x2d   :  { %77 = vperm.xlu1 %280, %v44_v2  }
  0x2e   :  { %p347_p5 = por %p346_p4, %p345_p3 }
  0x2f   :  { %261 = vmatpush3.bf16.msra.mxu0 %v260_v21 }
  0x30   :  { %p348_p6 = pnand %p347_p5, %p341_p2 }
  0x31   :  { %281 = vset.pattern.permute.xlu1 %v374_v5 }
  0x32   :  { %87 = vperm.xlu1 %281, %v44_v2  }
  0x36   :  { %282 = vset.pattern.permute.xlu1 %v375_v6 }
  0x37   :  { %97 = vperm.xlu1 %282, %v44_v2  }
  0x3b   :  { %283 = vset.pattern.permute.xlu1 %v376_v7 }
  0x3c   :  { %107 = vperm.xlu1 %283, %v44_v2  }
  0x3e   :  { %56 = vperm.xlu0 %278, %v44_v2  }
  0x40   :  { %284 = vset.pattern.permute.xlu1 %v378_v9 }
  0x41   :  { %117 = vperm.xlu1 %284, %v44_v2  }
  0x42   :  { %291 = vset.pattern.permute.xlu0 %v378_v9 }
  0x45   :  { %285 = vset.pattern.permute.xlu1 %v377_v8 }
  0xa7   :  { %v68_v23 = vpop.permute.xlu1 %67 }
  0xa8   :  { %vm69_vm2 = vcmp.eq.s32.totalorder %v68_v23, %v54_v33 }
  0xac   :  { %v78_v24 = vpop.permute.xlu1 %77 }
  0xad   :  { %vm79_vm4 = vcmp.eq.s32.totalorder %v78_v24, %v54_v33 }
  0xb1   :  { %v88_v25 = vpop.permute.xlu1 %87 }
  0xb2   :  { %vm89_vm5 = vcmp.eq.s32.totalorder %v88_v25, %v54_v33 }
  0xb5   :  { %v49_v10 = vpop.xlane.xlu0 %48 }
  0xb6   :  { %v50_v11 = vmax.f32 %v49_v10, 1.0  ;;  %v98_v26 = vpop.permute.xlu1 %97 }
  0xb7   :  { %vm99_vm6 = vcmp.eq.s32.totalorder %v98_v26, %v54_v33 }
  0xb8   :  { %294 = vrcp.f32 %v50_v11 }
  0xbb   :  { %v108_v27 = vpop.permute.xlu1 %107 }
  0xbc   :  { %vm109_vm7 = vcmp.eq.s32.totalorder %v108_v27, %v54_v33 }
  0xbd   :  { %v57_v35 = vpop.permute.xlu0 %56 }
  0xbe   :  { %vm58_vm3 = vcmp.eq.s32.totalorder %v57_v35, %v54_v33 }
  0xc0   :  { %v118_v28 = vpop.permute.xlu1 %117 }
  0xc1   :  { %vm119_vm8 = vcmp.eq.s32.totalorder %v118_v28, %v54_v33 }
  0xc2   :  { %v295_v12 = vpop.eup %294 }
  0xc3   :  { %v52_v13 = vmul.f32 %v295_v12, %v45_v1 }
  0xc5   :  { %61 = vperm.xlu1 %285, %v52_v13   ;;  %121 = vperm.xlu0 %291, %v52_v13  }
  0xc9   :  { %286 = vset.pattern.permute.xlu1 %v372_v0  ;;  %293 = vset.pattern.permute.xlu0 %v379_v14 }
  0xca   :  { %71 = vperm.xlu1 %286, %v52_v13  }
  0xce   :  { %287 = vset.pattern.permute.xlu1 %v373_v4 }
  0xcf   :  { %81 = vperm.xlu1 %287, %v52_v13  }
  0xd3   :  { %288 = vset.pattern.permute.xlu1 %v374_v5 }
  0xd4   :  { %91 = vperm.xlu1 %288, %v52_v13  }
  0xd8   :  { %289 = vset.pattern.permute.xlu1 %v375_v6 }
  0xd9   :  { %101 = vperm.xlu1 %289, %v52_v13  }
  0xdd   :  { %290 = vset.pattern.permute.xlu1 %v376_v7 }
  0xde   :  { %111 = vperm.xlu1 %290, %v52_v13  }
  0xe2   :  { %292 = vset.pattern.permute.xlu1 %v379_v14 }
  0xe3   :  { %127 = vperm.xlu1 %292, %v44_v2  }
  0xe7   :  { %131 = vperm.xlu1 %292, %v52_v13  }
 0x144   :  { %v62_v29 = vpop.permute.xlu1 %61  ;;  %v122_v48 = vpop.permute.xlu0 %121 }
 0x145   :  { %v64_v38 = vsel %vm58_vm3, %v62_v29, 0.0  ;;  %v124_v51 = vsel %vm119_vm8, %v122_v48, 0.0 }
 0x149   :  { %v72_v30 = vpop.permute.xlu1 %71 }
 0x14a   :  { %v74_v36 = vsel %vm69_vm2, %v72_v30, 0.0 }
 0x14b   :  { %v75_v40 = vadd.f32 %v74_v36, %v64_v38 }
 0x14e   :  { %v82_v32 = vpop.permute.xlu1 %81 }
 0x14f   :  { %v84_v39 = vsel %vm79_vm4, %v82_v32, 0.0 }
 0x150   :  { %v85_v42 = vadd.f32 %v84_v39, %v75_v40 }
 0x153   :  { %v92_v34 = vpop.permute.xlu1 %91 }
 0x154   :  { %v94_v41 = vsel %vm89_vm5, %v92_v34, 0.0 }
 0x155   :  { %v95_v45 = vadd.f32 %v94_v41, %v85_v42 }
 0x158   :  { %v102_v37 = vpop.permute.xlu1 %101 }
 0x159   :  { %v104_v43 = vsel %vm99_vm6, %v102_v37, 0.0 }
 0x15a   :  { %v105_v47 = vadd.f32 %v104_v43, %v95_v45 }
 0x15d   :  { %v112_v44 = vpop.permute.xlu1 %111 }
 0x15e   :  { %v114_v46 = vsel %vm109_vm7, %v112_v44, 0.0 }
 0x15f   :  { %v115_v49 = vadd.f32 %v114_v46, %v105_v47 }
 0x161   :  { %v125_v53 = vadd.f32 %v124_v51, %v115_v49 }
 0x162   :  { %v128_v50 = vpop.permute.xlu1 %127 }
 0x163   :  { %vm129_vm9 = vcmp.eq.s32.totalorder %v128_v50, %v54_v33 }
 0x166   :  { %v132_v52 = vpop.permute.xlu1 %131 }
 0x167   :  { %v134_v54 = vsel %vm129_vm9, %v132_v52, 0.0 }
 0x168   :  { %v135_v55 = vadd.f32 %v134_v54, %v125_v53 }
 0x16a   :  { %254 = vmatmul.mubr.msk.f32.vlgmr.msra.gmra.mrb[0].mxu0 %vm147_vm10, %v135_v55 }
 0x23d   :  { %v217_v57 = vpop.f32.mrb[0].mxu0 }
 0x23e   :  { %v218_v58 = vadd.f32 %v238_v56, %v217_v57  ;;  %v255_v59 = vpop.f32.mrb[1].mxu0 }
 0x240   :  { %221 = vst [vmem:[#allocation7] sm:$0x3] %v218_v58 }
 0x241   :  { %351 = shalt.err (!%p348_p6)
}
 0x242   :  { %s352_s21 = scalar_lea.hbm %s462_s4, 32 }
 0x243   :  { %p353_p7 = scmp.ne.s32.totalorder %s462_s4, %s352_s21  ;;  %p356_p8 = scmp.lt.u32.totalorder %s352_s21, %s462_s4 }
 0x245   :  { %p358_p9 = pnand %p356_p8, %p353_p7 }
 0x247   :  { %361 = shalt.err (!%p358_p9)
}
 0x248   :  { %231 = dma.vmem_to_hbm [thread:$0]  %s229_s17, 32, %s462_s4, [#allocation4]  }
 0x249   :  { %366 = dma.done.wait [#allocation4], 32  }
 0x24a   :  { %367 = vsyncadd [#allocation4], 4294967264 }
 0x24b   :  { %235 = vsyncpa [#allocation3], 1 }
 0x24c   :  { %236 = vsyncpa [#allocation6], 1 }
 0x24d   :  { %237 = vsyncpa [#allocation4], 1 }

</bundles_post_ra>
